<compile_context>
chip_gen: v5e
topology: v5e:2x2
jax: 0.10.0
libtpu: 0.0.40
codegen_flags: <defaults>
</compile_context>

<pallas_src>
import jax
import jax.numpy as jnp
from jax.experimental import pallas as pl
from jax.experimental.pallas import tpu as pltpu


def _round_up(x, m):
    return ((x + m - 1) // m) * m


# ---------------------------------------------------------------------------
# Kernels
# ---------------------------------------------------------------------------

def _embed_body(x_ref, w1, b1, w2, b2, o_ref):
    # Cast fp32 activations to bf16 in-kernel (right before the MXU): the x stream is
    # read from HBM exactly once as fp32, no wrapper-side bf16 copy.
    x = x_ref[...].astype(jnp.bfloat16)
    h = jnp.dot(x, w1, preferred_element_type=jnp.float32)      # (tm, Hpad) fp32 acc
    h = jnp.maximum(h + b1, 0.0)                                 # bias + ReLU in fp32
    o = jnp.dot(h.astype(jnp.bfloat16), w2,
                preferred_element_type=jnp.float32)              # (tm, Epad) fp32 acc
    o_ref[...] = (o + b2).astype(o_ref.dtype)                    # lane-dense bf16 store


def _siamese_kernel(x1_ref, x2_ref, w1_ref, b1_ref, w2_ref, b2_ref, o1_ref, o2_ref):
    # Shared weights loaded once per grid step; both siamese streams use them.
    w1, b1 = w1_ref[...], b1_ref[...]
    w2, b2 = w2_ref[...], b2_ref[...]
    _embed_body(x1_ref, w1, b1, w2, b2, o1_ref)
    _embed_body(x2_ref, w1, b1, w2, b2, o2_ref)


def _embed_kernel(x_ref, w1_ref, b1_ref, w2_ref, b2_ref, o_ref):
    _embed_body(x_ref, w1_ref[...], b1_ref[...], w2_ref[...], b2_ref[...], o_ref)


# ---------------------------------------------------------------------------
# Wrappers
# ---------------------------------------------------------------------------

def _prep_params(params):
    """Zero-pad H and E up to 128 lanes; cast weights to bf16 (biases stay fp32)."""
    w1, b1, w2, b2 = params
    d, h = w1.shape
    e = w2.shape[1]
    hpad = _round_up(h, 128)
    epad = _round_up(e, 128)
    w1p = jnp.pad(w1, ((0, 0), (0, hpad - h))).astype(jnp.bfloat16)        # (D, Hpad)
    b1p = jnp.pad(b1.reshape(1, -1), ((0, 0), (0, hpad - h)))              # (1, Hpad) f32
    w2p = jnp.pad(w2, ((0, hpad - h), (0, epad - e))).astype(jnp.bfloat16)  # (Hpad, Epad)
    b2p = jnp.pad(b2.reshape(1, -1), ((0, 0), (0, epad - e)))              # (1, Epad) f32
    return w1p, b1p, w2p, b2p, d, e, epad


def _pick_tm(n_rows, d, n_streams, tm_max=512, act_budget_bytes=16 << 20):
    """Batch tile: multiple of 8, as large as fits the activation VMEM budget
    (double-buffered fp32 x tiles for every stream), capped at tm_max, and split
    into >=2 tiles when the batch allows (v7x megacore)."""
    per_row = 2 * n_streams * d * 4           # double-buffered fp32 bytes per batch row
    tm_fit = max(8, (act_budget_bytes // per_row) // 8 * 8)
    tm = min(tm_max, tm_fit, _round_up(n_rows, 8))
    if n_rows >= 16:
        tm = min(tm, max(8, _round_up(pl.cdiv(n_rows, 2), 8)))
    return max(8, tm)


def _compiler_params():
    return pltpu.CompilerParams(
        dimension_semantics=("parallel",),        # batch tiles independent -> megacore
        vmem_limit_bytes=40 * 1024 * 1024,        # above v5e's 16 MiB scoped default
    )


def siamese_forward(x1, x2, params, *, tm_max=512):
    """SiameseNet.forward: same embedding net (shared params) on x1 and x2, fused into
    a single Pallas kernel invocation (one grid step handles a tile of each stream)."""
    w1p, b1p, w2p, b2p, d, e, epad = _prep_params(params)
    hpad = w1p.shape[1]

    n1, n2 = x1.shape[0], x2.shape[0]
    x1f = x1.reshape(n1, -1)                      # flatten NCHW -> (N, D): free view
    x2f = x2.reshape(n2, -1)
    assert x1f.shape[1] == d and x2f.shape[1] == d

    n = max(n1, n2)
    if n1 != n2:                                  # rare: equalize so one grid serves both
        x1f = jnp.pad(x1f, ((0, n - n1), (0, 0)))
        x2f = jnp.pad(x2f, ((0, n - n2), (0, 0)))

    tm = _pick_tm(n, d, n_streams=2, tm_max=tm_max)
    grid = (pl.cdiv(n, tm),)                      # partial last block handled by Pallas

    cost = pl.CostEstimate(
        flops=2 * 2 * n * (d * hpad + hpad * epad),
        transcendentals=0,
        bytes_accessed=(2 * n * d * 4 + w1p.size * 2 + w2p.size * 2
                        + b1p.size * 4 + b2p.size * 4 + 2 * n * epad * 2),
    )

    grid_spec = pltpu.PrefetchScalarGridSpec(
        num_scalar_prefetch=0,
        grid=grid,
        in_specs=[
            pl.BlockSpec((tm, d), lambda i: (i, 0)),        # x1: tiled on batch (fp32)
            pl.BlockSpec((tm, d), lambda i: (i, 0)),        # x2: tiled on batch (fp32)
            pl.BlockSpec(w1p.shape, lambda i: (0, 0)),      # w1: resident across tiles
            pl.BlockSpec(b1p.shape, lambda i: (0, 0)),      # b1: resident
            pl.BlockSpec(w2p.shape, lambda i: (0, 0)),      # w2: resident
            pl.BlockSpec(b2p.shape, lambda i: (0, 0)),      # b2: resident
        ],
        out_specs=(
            pl.BlockSpec((tm, epad), lambda i: (i, 0)),
            pl.BlockSpec((tm, epad), lambda i: (i, 0)),
        ),
    )

    out1, out2 = pl.pallas_call(
        _siamese_kernel,
        out_shape=(jax.ShapeDtypeStruct((n, epad), jnp.bfloat16),
                   jax.ShapeDtypeStruct((n, epad), jnp.bfloat16)),
        grid_spec=grid_spec,
        cost_estimate=cost,
        compiler_params=_compiler_params(),
    )(x1f, x2f, w1p, b1p, w2p, b2p)

    # Slice off lane padding and return fp32 (module dtype); values are bf16-rounded —
    # an explicitly accepted precision decision for the bf16 MXU pipeline.
    return (out1[:n1, :e].astype(jnp.float32),
            out2[:n2, :e].astype(jnp.float32))


def get_embedding(x, params, *, tm_max=512):
    """SiameseNet.get_embedding: shared embedding net on a single batch (no throwaway
    second stream)."""
    w1p, b1p, w2p, b2p, d, e, epad = _prep_params(params)
    hpad = w1p.shape[1]

    n = x.shape[0]
    xf = x.reshape(n, -1)
    assert xf.shape[1] == d

    tm = _pick_tm(n, d, n_streams=1, tm_max=tm_max)
    grid = (pl.cdiv(n, tm),)

    cost = pl.CostEstimate(
        flops=2 * n * (d * hpad + hpad * epad),
        transcendentals=0,
        bytes_accessed=(n * d * 4 + w1p.size * 2 + w2p.size * 2
                        + b1p.size * 4 + b2p.size * 4 + n * epad * 2),
    )

    grid_spec = pltpu.PrefetchScalarGridSpec(
        num_scalar_prefetch=0,
        grid=grid,
        in_specs=[
            pl.BlockSpec((tm, d), lambda i: (i, 0)),
            pl.BlockSpec(w1p.shape, lambda i: (0, 0)),
            pl.BlockSpec(b1p.shape, lambda i: (0, 0)),
            pl.BlockSpec(w2p.shape, lambda i: (0, 0)),
            pl.BlockSpec(b2p.shape, lambda i: (0, 0)),
        ],
        out_specs=pl.BlockSpec((tm, epad), lambda i: (i, 0)),
    )

    out = pl.pallas_call(
        _embed_kernel,
        out_shape=jax.ShapeDtypeStruct((n, epad), jnp.bfloat16),
        grid_spec=grid_spec,
        cost_estimate=cost,
        compiler_params=_compiler_params(),
    )(xf, w1p, b1p, w2p, b2p)

    return out[:, :e].astype(jnp.float32)


def init_params(key, d, h, e):
    k1, k2, k3, k4 = jax.random.split(key, 4)
    w1 = jax.random.normal(k1, (d, h), jnp.float32) * 0.02
    b1 = jax.random.normal(k2, (1, h), jnp.float32) * 0.01
    w2 = jax.random.normal(k3, (h, e), jnp.float32) * 0.02
    b2 = jax.random.normal(k4, (1, e), jnp.float32) * 0.01
    return w1, b1, w2, b2


if __name__ == "__main__":
    key = jax.random.PRNGKey(0)
    kx1, kx2, kp = jax.random.split(key, 3)

    # Small shapes consistent with an image siamese net: NCHW = (2, 4, 16, 16)
    N, C, H_img, W_img = 2, 4, 16, 16
    D = C * H_img * W_img        # 1024 flattened features
    HID = 32                     # hidden width
    E = 16                       # embedding dim

    x1 = jax.random.normal(kx1, (N, C, H_img, W_img), jnp.float32)
    x2 = jax.random.normal(kx2, (N, C, H_img, W_img), jnp.float32)
    params = init_params(kp, D, HID, E)

    out1, out2 = siamese_forward(x1, x2, params)
    emb = get_embedding(x1, params)
    jax.block_until_ready((out1, out2, emb))

    # Pure-JAX reference with matched precision (bf16 operands, fp32 MXU accumulation,
    # bf16 final rounding).
    w1, b1, w2, b2 = params

    def ref_embed(x):
        xf = x.reshape(x.shape[0], -1).astype(jnp.bfloat16)
        h = jnp.dot(xf, w1.astype(jnp.bfloat16),
                    preferred_element_type=jnp.float32) + b1
        h = jnp.maximum(h, 0.0)
        o = jnp.dot(h.astype(jnp.bfloat16), w2.astype(jnp.bfloat16),
                    preferred_element_type=jnp.float32) + b2
        return o.astype(jnp.bfloat16).astype(jnp.float32)

    r1, r2 = ref_embed(x1), ref_embed(x2)
    assert out1.shape == (N, E) and out2.shape == (N, E) and emb.shape == (N, E)
    assert jnp.allclose(out1, r1, atol=2e-3, rtol=2e-2)
    assert jnp.allclose(out2, r2, atol=2e-3, rtol=2e-2)
    assert jnp.allclose(emb, r1, atol=2e-3, rtol=2e-2)

    print("KERNEL_OK")
</pallas_src>

<mosaic_0001>
module attributes {stable_mosaic.version = 11 : i64} {
  func.func @_siamese_kernel(%arg0: i32, %arg1: memref<8x1024xf32, #tpu.memory_space<vmem>>, %arg2: memref<8x1024xf32, #tpu.memory_space<vmem>>, %arg3: memref<1024x128xbf16, #tpu.memory_space<vmem>>, %arg4: memref<1x128xf32, #tpu.memory_space<vmem>>, %arg5: memref<128x128xbf16, #tpu.memory_space<vmem>>, %arg6: memref<1x128xf32, #tpu.memory_space<vmem>>, %arg7: memref<8x128xbf16, #tpu.memory_space<vmem>>, %arg8: memref<8x128xbf16, #tpu.memory_space<vmem>>) attributes {dimension_semantics = [#tpu.dimension_semantics<parallel>], iteration_bounds = array<i64: 1>, scalar_prefetch = 0 : i64, scratch_operands = 0 : i64, tpu.core_type = #tpu.core_type<tc>, window_params = [{transform_indices = @transform_0, window_bounds = array<i64: 8, 1024>}, {transform_indices = @transform_1, window_bounds = array<i64: 8, 1024>}, {pipeline_mode = #tpu.pipeline_mode<synchronous>, transform_indices = @transform_2, window_bounds = array<i64: 1024, 128>}, {pipeline_mode = #tpu.pipeline_mode<synchronous>, transform_indices = @transform_3, window_bounds = array<i64: 1, 128>}, {pipeline_mode = #tpu.pipeline_mode<synchronous>, transform_indices = @transform_4, window_bounds = array<i64: 128, 128>}, {pipeline_mode = #tpu.pipeline_mode<synchronous>, transform_indices = @transform_5, window_bounds = array<i64: 1, 128>}, {transform_indices = @transform_6, window_bounds = array<i64: 8, 128>}, {transform_indices = @transform_7, window_bounds = array<i64: 8, 128>}]} {
    %c0 = arith.constant 0 : index
    %c0_0 = arith.constant 0 : index
    %0 = vector.load %arg3[%c0, %c0_0] : memref<1024x128xbf16, #tpu.memory_space<vmem>>, vector<1024x128xbf16>
    %c0_1 = arith.constant 0 : index
    %c0_2 = arith.constant 0 : index
    %1 = vector.load %arg4[%c0_1, %c0_2] : memref<1x128xf32, #tpu.memory_space<vmem>>, vector<1x128xf32>
    %c0_3 = arith.constant 0 : index
    %c0_4 = arith.constant 0 : index
    %2 = vector.load %arg5[%c0_3, %c0_4] : memref<128x128xbf16, #tpu.memory_space<vmem>>, vector<128x128xbf16>
    %c0_5 = arith.constant 0 : index
    %c0_6 = arith.constant 0 : index
    %3 = vector.load %arg6[%c0_5, %c0_6] : memref<1x128xf32, #tpu.memory_space<vmem>>, vector<1x128xf32>
    %c0_7 = arith.constant 0 : index
    %c0_8 = arith.constant 0 : index
    %4 = vector.load %arg1[%c0_7, %c0_8] : memref<8x1024xf32, #tpu.memory_space<vmem>>, vector<8x1024xf32>
    %5 = arith.truncf %4 : vector<8x1024xf32> to vector<8x1024xbf16>
    %cst = arith.constant dense<0.000000e+00> : vector<8x128xf32>
    %6 = tpu.matmul %5, %0, %cst {dimension_numbers = #tpu.dot_dimension_numbers<[1], [0], [0], [1], [0, 0, 1, 1], [], []>} : vector<8x1024xbf16>, vector<1024x128xbf16>, vector<8x128xf32> -> vector<8x128xf32>
    %7 = vector.broadcast %1 : vector<1x128xf32> to vector<8x128xf32>
    %8 = arith.addf %6, %7 : vector<8x128xf32>
    %cst_9 = arith.constant 0.000000e+00 : f32
    %9 = vector.broadcast %cst_9 : f32 to vector<8x128xf32>
    %10 = arith.maximumf %8, %9 : vector<8x128xf32>
    %11 = arith.truncf %10 : vector<8x128xf32> to vector<8x128xbf16>
    %cst_10 = arith.constant dense<0.000000e+00> : vector<8x128xf32>
    %12 = tpu.matmul %11, %2, %cst_10 {dimension_numbers = #tpu.dot_dimension_numbers<[1], [0], [0], [1], [0, 0, 1, 1], [], []>} : vector<8x128xbf16>, vector<128x128xbf16>, vector<8x128xf32> -> vector<8x128xf32>
    %13 = vector.broadcast %3 : vector<1x128xf32> to vector<8x128xf32>
    %14 = arith.addf %12, %13 : vector<8x128xf32>
    %15 = arith.truncf %14 : vector<8x128xf32> to vector<8x128xbf16>
    %c0_11 = arith.constant 0 : index
    %c0_12 = arith.constant 0 : index
    %16 = vector.load %arg7[%c0_11, %c0_12] : memref<8x128xbf16, #tpu.memory_space<vmem>>, vector<8x128xbf16>
    tpu.vector_store %arg7[%c0_11, %c0_12], %15 {strides = array<i32>} : memref<8x128xbf16, #tpu.memory_space<vmem>>, vector<8x128xbf16>,
    %c0_13 = arith.constant 0 : index
    %c0_14 = arith.constant 0 : index
    %17 = vector.load %arg2[%c0_13, %c0_14] : memref<8x1024xf32, #tpu.memory_space<vmem>>, vector<8x1024xf32>
    %18 = arith.truncf %17 : vector<8x1024xf32> to vector<8x1024xbf16>
    %cst_15 = arith.constant dense<0.000000e+00> : vector<8x128xf32>
    %19 = tpu.matmul %18, %0, %cst_15 {dimension_numbers = #tpu.dot_dimension_numbers<[1], [0], [0], [1], [0, 0, 1, 1], [], []>} : vector<8x1024xbf16>, vector<1024x128xbf16>, vector<8x128xf32> -> vector<8x128xf32>
    %20 = vector.broadcast %1 : vector<1x128xf32> to vector<8x128xf32>
    %21 = arith.addf %19, %20 : vector<8x128xf32>
    %cst_16 = arith.constant 0.000000e+00 : f32
    %22 = vector.broadcast %cst_16 : f32 to vector<8x128xf32>
    %23 = arith.maximumf %21, %22 : vector<8x128xf32>
    %24 = arith.truncf %23 : vector<8x128xf32> to vector<8x128xbf16>
    %cst_17 = arith.constant dense<0.000000e+00> : vector<8x128xf32>
    %25 = tpu.matmul %24, %2, %cst_17 {dimension_numbers = #tpu.dot_dimension_numbers<[1], [0], [0], [1], [0, 0, 1, 1], [], []>} : vector<8x128xbf16>, vector<128x128xbf16>, vector<8x128xf32> -> vector<8x128xf32>
    %26 = vector.broadcast %3 : vector<1x128xf32> to vector<8x128xf32>
    %27 = arith.addf %25, %26 : vector<8x128xf32>
    %28 = arith.truncf %27 : vector<8x128xf32> to vector<8x128xbf16>
    %c0_18 = arith.constant 0 : index
    %c0_19 = arith.constant 0 : index
    %29 = vector.load %arg8[%c0_18, %c0_19] : memref<8x128xbf16, #tpu.memory_space<vmem>>, vector<8x128xbf16>
    tpu.vector_store %arg8[%c0_18, %c0_19], %28 {strides = array<i32>} : memref<8x128xbf16, #tpu.memory_space<vmem>>, vector<8x128xbf16>,
    return
  }
  func.func @transform_0(%arg0: i32) -> (i32, i32) {
    %c0_i32 = arith.constant 0 : i32
    %c0_i32_0 = arith.constant 0 : i32
    return %arg0, %c0_i32 : i32, i32
  }
  func.func @transform_1(%arg0: i32) -> (i32, i32) {
    %c0_i32 = arith.constant 0 : i32
    %c0_i32_0 = arith.constant 0 : i32
    return %arg0, %c0_i32 : i32, i32
  }
  func.func @transform_2(%arg0: i32) -> (i32, i32) {
    %c0_i32 = arith.constant 0 : i32
    %c0_i32_0 = arith.constant 0 : i32
    %c0_i32_1 = arith.constant 0 : i32
    return %c0_i32, %c0_i32_0 : i32, i32
  }
  func.func @transform_3(%arg0: i32) -> (i32, i32) {
    %c0_i32 = arith.constant 0 : i32
    %c0_i32_0 = arith.constant 0 : i32
    %c0_i32_1 = arith.constant 0 : i32
    return %c0_i32, %c0_i32_0 : i32, i32
  }
  func.func @transform_4(%arg0: i32) -> (i32, i32) {
    %c0_i32 = arith.constant 0 : i32
    %c0_i32_0 = arith.constant 0 : i32
    %c0_i32_1 = arith.constant 0 : i32
    return %c0_i32, %c0_i32_0 : i32, i32
  }
  func.func @transform_5(%arg0: i32) -> (i32, i32) {
    %c0_i32 = arith.constant 0 : i32
    %c0_i32_0 = arith.constant 0 : i32
    %c0_i32_1 = arith.constant 0 : i32
    return %c0_i32, %c0_i32_0 : i32, i32
  }
  func.func @transform_6(%arg0: i32) -> (i32, i32) {
    %c0_i32 = arith.constant 0 : i32
    %c0_i32_0 = arith.constant 0 : i32
    return %arg0, %c0_i32 : i32, i32
  }
  func.func @transform_7(%arg0: i32) -> (i32, i32) {
    %c0_i32 = arith.constant 0 : i32
    %c0_i32_0 = arith.constant 0 : i32
    return %arg0, %c0_i32 : i32, i32
  }
}

</mosaic_0001>

<bundles_post_ra>
// kernel: tpu_custom_call.1
= control target key start
LH: loop header
LB: loop body
LE: loop exit
PB: predicated region body
PF: predicated region fallthrough
CT: control target
= control target key end

     0   :  { %13 = vsyncpa [#allocation3], 0  ;;  %s2007_s0 = inlined_call_operand.hbm [shape: f32[2,1024], index: 0, kind: input, shape index: {}]   ;;  %s2008_s1 = inlined_call_operand.hbm [shape: f32[2,1024], index: 1, kind: input, shape index: {}]   ;;  %s2009_s2 = inlined_call_operand.hbm [shape: bf16[1024,128], index: 2, kind: input, shape index: {}]   ;;  %s2010_s3 = inlined_call_operand.vmem [shape: f32[1,128], index: 3, kind: input, shape index: {}]   ;;  %s2011_s4 = inlined_call_operand.hbm [shape: bf16[128,128], index: 4, kind: input, shape index: {}]   ;;  %s2012_s5 = inlined_call_operand.vmem [shape: f32[1,128], index: 5, kind: input, shape index: {}]   ;;  %s2013_s6 = inlined_call_operand.hbm [shape: bf16[2,128], index: 6, kind: output, shape index: {0}]   ;;  %s2014_s7 = inlined_call_operand.hbm [shape: bf16[2,128], index: 7, kind: output, shape index: {1}]  }
   0x1   :  { %14 = vsyncpa [#allocation6], 0 }
   0x2   :  { %15 = vsyncpa [#allocation9], 0 }
   0x3   :  { %16 = vsyncpa [#allocation4], 0 }
   0x4   :  { %17 = vsyncpa [#allocation12], 0 }
   0x5   :  { %21 = vsyncadd [#allocation3], 768  ;;  %s22_s26 = sshll.u32 %s2007_s0, 4  ;;  %s1638_s27 = smov [#allocation2]   ;;  %s23_s26 = int_to_ptr.hbm [resolvable:$true] %s22_s26 }
   0x6   :  { %s24_s28 = sshll.u32 %s1638_s27, 4  ;;  %s1639_s29 = smov 256   ;;  %s25_s28 = int_to_ptr.vmem [resolvable:$true] %s24_s28 }
   0x7   :  { %s1640_s30 = smov 16  }
   0x8   :  { %30 = dma.hbm_to_vmem [thread:$0]  %s23_s26, 256, %s25_s28, [#allocation3], %s1639_s29, %s1639_s29, %s1640_s30  }
   0x9   :  { %34 = vsyncadd [#allocation6], 768  ;;  %s35_s10 = sshll.u32 %s2008_s1, 4  ;;  %s1641_s11 = smov [#allocation5]   ;;  %s36_s10 = int_to_ptr.hbm [resolvable:$true] %s35_s10 }
   0xa   :  { %s37_s12 = sshll.u32 %s1641_s11, 4  ;;  %s48_s0 = sshll.u32 %s2009_s2, 4  ;;  %s38_s12 = int_to_ptr.vmem [resolvable:$true] %s37_s12  ;;  %s49_s0 = int_to_ptr.hbm [resolvable:$true] %s48_s0 }
   0xb   :  { %43 = dma.hbm_to_vmem [thread:$0]  %s36_s10, 256, %s38_s12, [#allocation6], %s1639_s29, %s1639_s29, %s1640_s30  }
   0xc   :  { %s1642_s15 = smov [#allocation7]   ;;  %s1643_s17 = smov 64  }
   0xd   :  { %s50_s16 = sshll.u32 %s1642_s15, 4  ;;  %s1644_s18 = smov 4   ;;  %s51_s16 = int_to_ptr.vmem [resolvable:$true] %s50_s16 }
   0xe   :  { %56 = dma.hbm_to_vmem [thread:$0]  %s49_s0, 8192, %s51_s16, [#allocation6], %s1643_s17, %s1643_s17, %s1644_s18  }
   0xf   :  { %s63_s1 = sshll.u32 %s2011_s4, 4  ;;  %s1645_s21 = smov [#allocation8]   ;;  %s64_s1 = int_to_ptr.hbm [resolvable:$true] %s63_s1 }
  0x10   :  { %s65_s22 = sshll.u32 %s1645_s21, 4  ;;  %s66_s22 = int_to_ptr.vmem [resolvable:$true] %s65_s22 }
  0x11   :  { %71 = dma.hbm_to_vmem [thread:$0]  %s64_s1, 1024, %s66_s22, [#allocation9], %s1643_s17, %s1643_s17, %s1644_s18  }
  0x12   :  { %1628 = dma.done.wait [#allocation3], 1024  }
  0x13   :  { %1629 = vsyncadd [#allocation3], 4294966272 }
  0x14   :  { %1630 = dma.done.wait [#allocation6], 9216  }
  0x15   :  { %1631 = vsyncadd [#allocation6], 4294958080 }
  0x16   :  { %1632 = dma.done.wait [#allocation9], 1024  }
  0x17   :  { %1633 = vsyncadd [#allocation9], 4294966272  ;;  %v1703_v0 = vld [vmem:[#allocation7 + $0x38] sm:$0xff]  ;;  %v1713_v4 = vld [vmem:[#allocation7 + $0x30] sm:$0xff]  ;;  %vm851_vm0 = vcmask 1040384   ;;  %vm855_vm1 = vcmask 1041409  }
  0x18   :  { %v1705_v1 = vld [vmem:[#allocation7 + $0x78] sm:$0xff]  ;;  %678 = vmatpush.bf16.msra.mxu0 %v1703_v0  ;;  %v1715_v5 = vld [vmem:[#allocation7 + $0x70] sm:$0xff]  ;;  %v1725_v8 = vld [vmem:[#allocation7 + $0x28] sm:$0xff]  ;;  %vm859_vm2 = vcmask 1042434   ;;  %vm863_vm3 = vcmask 1043459  }
  0x19   :  { %v1707_v2 = vld [vmem:[#allocation7 + $0xb8] sm:$0xff]  ;;  %691 = vmatpush.bf16.msra.mxu1 %v1705_v1  ;;  %v1719_v6 = vld [vmem:[#allocation7 + $0xb0] sm:$0xff]  ;;  %v1727_v9 = vld [vmem:[#allocation7 + $0x68] sm:$0xff] }
  0x1a   :  { %v1709_v3 = vld [vmem:[#allocation7 + $0xf8] sm:$0xff]  ;;  %704 = vmatpush.bf16.msra.mxu2 %v1707_v2  ;;  %v1721_v7 = vld [vmem:[#allocation7 + $0xf0] sm:$0xff]  ;;  %v1731_v10 = vld [vmem:[#allocation7 + $0xa8] sm:$0xff] }
  0x1b   :  { %717 = vmatpush.bf16.msra.mxu3 %v1709_v3  ;;  %v1733_v11 = vld [vmem:[#allocation7 + $0xe8] sm:$0xff]  ;;  %v1737_v12 = vld [vmem:[#allocation7 + $0x20] sm:$0xff]  ;;  %v1747_v16 = vld [vmem:[#allocation7 + $0x18] sm:$0xff] }
  0x1c   :  { %679 = vmatpush.bf16.msra.mxu0 %v1713_v4  ;;  %v1739_v13 = vld [vmem:[#allocation7 + $0x60] sm:$0xff]  ;;  %v238_v18 = vld [vmem:[#allocation2 + $0x10] sm:$0xff]  ;;  %v1751_v19 = vld [vmem:[#allocation7 + $0x58] sm:$0xff] }
  0x1d   :  { %692 = vmatpush.bf16.msra.mxu1 %v1715_v5  ;;  %v1743_v14 = vld [vmem:[#allocation7 + $0xa0] sm:$0xff]  ;;  %v242_v21 = vld [vmem:[#allocation2 + $0x30] sm:$0xff]  ;;  %v1755_v22 = vld [vmem:[#allocation7 + $0x98] sm:$0xff]  ;;  %254 = vst [vmem:[#allocation1 + $0x1] ss:$4 sm:$0xff] %v238_v18 }
  0x1e   :  { %705 = vmatpush.bf16.msra.mxu2 %v1719_v6  ;;  %v1745_v15 = vld [vmem:[#allocation7 + $0xe0] sm:$0xff]  ;;  %v1757_v23 = vld [vmem:[#allocation7 + $0xd8] sm:$0xff]  ;;  %258 = vst [vmem:[#allocation1 + $0x3] ss:$4 sm:$0xff] %v242_v21  ;;  %v1761_v24 = vld [vmem:[#allocation7 + $0x10] sm:$0xff] }
  0x1f   :  { %718 = vmatpush.bf16.msra.mxu3 %v1721_v7  ;;  %v236_v17 = vld [vmem:[#allocation2] sm:$0xff]  ;;  %v1763_v25 = vld [vmem:[#allocation7 + $0x50] sm:$0xff]  ;;  %v1771_v28 = vld [vmem:[#allocation7 + $0x8] sm:$0xff] }
  0x20   :  { %680 = vmatpush.bf16.msra.mxu0 %v1725_v8  ;;  %v240_v20 = vld [vmem:[#allocation2 + $0x20] sm:$0xff]  ;;  %252 = vst [vmem:[#allocation1] ss:$4 sm:$0xff] %v236_v17  ;;  %v1767_v26 = vld [vmem:[#allocation7 + $0x90] sm:$0xff]  ;;  %v1773_v29 = vld [vmem:[#allocation7 + $0x48] sm:$0xff] }
  0x21   :  { %693 = vmatpush.bf16.msra.mxu1 %v1727_v9  ;;  %256 = vst [vmem:[#allocation1 + $0x2] ss:$4 sm:$0xff] %v240_v20  ;;  %v1769_v27 = vld [vmem:[#allocation7 + $0xd0] sm:$0xff]  ;;  %v237_v30 = vld [vmem:[#allocation2 + $0x8] sm:$0xff]  ;;  %v239_v33 = vld [vmem:[#allocation2 + $0x18] sm:$0xff] }
  0x22   :  { %706 = vmatpush.bf16.msra.mxu2 %v1731_v10  ;;  %2025 = vst [vmem:[#allocation18_spill] sm:$0xff] %v1769_v27  ;;  %v1777_v31 = vld [vmem:[#allocation7 + $0x88] sm:$0xff]  ;;  %v875_v34 = vld [vmem:[#allocation5] sm:$0xff]  ;;  %v877_v35 = vld [vmem:[#allocation5 + $0x10] sm:$0xff] }
  0x23   :  { %719 = vmatpush.bf16.msra.mxu3 %v1733_v11  ;;  %v1779_v32 = vld [vmem:[#allocation7 + $0xc8] sm:$0xff]  ;;  %260 = vst [vmem:[#allocation1 + $0x20] ss:$4 sm:$0xff] %v237_v30  ;;  %v879_v36 = vld [vmem:[#allocation5 + $0x20] sm:$0xff]  ;;  %v881_v44 = vld [vmem:[#allocation5 + $0x30] sm:$0xff] }
  0x24   :  { %681 = vmatpush.bf16.msra.mxu0 %v1737_v12  ;;  %2026 = vst [vmem:[#allocation19_spill] sm:$0xff] %v1779_v32  ;;  %v1783_v37 = vld [vmem:[#allocation7] sm:$0xff]  ;;  %v1795_v46 = vld [vmem:[#allocation7 + $0x138] sm:$0xff]  ;;  %v241_v47 = vld [vmem:[#allocation2 + $0x28] sm:$0xff] }
  0x25   :  { %694 = vmatpush.bf16.msra.mxu1 %v1739_v13  ;;  %262 = vst [vmem:[#allocation1 + $0x21] ss:$4 sm:$0xff] %v239_v33  ;;  %v1785_v38 = vld [vmem:[#allocation7 + $0x40] sm:$0xff]  ;;  %v1797_v48 = vld [vmem:[#allocation7 + $0x178] sm:$0xff]  ;;  %v1809_v56 = vld [vmem:[#allocation7 + $0x130] sm:$0xff] }
  0x26   :  { %707 = vmatpush.bf16.msra.mxu2 %v1743_v14  ;;  %v1789_v43 = vld [vmem:[#allocation7 + $0x80] sm:$0xff]  ;;  %v243_v49 = vld [vmem:[#allocation2 + $0x38] sm:$0xff]  ;;  %264 = vst [vmem:[#allocation1 + $0x22] ss:$4 sm:$0xff] %v241_v47  ;;  %v1811_v57 = vld [vmem:[#allocation7 + $0x170] sm:$0xff] }
  0x27   :  { %720 = vmatpush.bf16.msra.mxu3 %v1745_v15  ;;  %v1793_v45 = vld [vmem:[#allocation7 + $0xc0] sm:$0xff]  ;;  %v1799_v50 = vld [vmem:[#allocation7 + $0x1b8] sm:$0xff]  ;;  %266 = vst [vmem:[#allocation1 + $0x23] ss:$4 sm:$0xff] %v243_v49  ;;  %v1815_v58 = vld [vmem:[#allocation7 + $0x1b0] sm:$0xff] }
  0x28   :  { %682 = vmatpush.bf16.msra.mxu0 %v1747_v16  ;;  %v269_v39 = vld.sshfl [vmem:[#allocation1 + $0x10] sm:$0xff pattern:$0x73625140]  ;;  %v267_v40 = vld.sshfl [vmem:[#allocation1] sm:$0xff pattern:$0x73625140] }
  0x29   :  { %695 = vmatpush.bf16.msra.mxu1 %v1751_v19  ;;  %v270_v41 = vld.sshfl [vmem:[#allocation1 + $0x18] sm:$0xff pattern:$0x73625140]  ;;  %v268_v42 = vld.sshfl [vmem:[#allocation1 + $0x8] sm:$0xff pattern:$0x73625140]  ;;  %v285_v52 = vpack.c.bf16 %v269_v39, %v269_v39  ;;  %v283_v53 = vpack.c.bf16 %v267_v40, %v267_v40 }
  0x2a   :  { %708 = vmatpush.bf16.msra.mxu2 %v1755_v22  ;;  %891 = vst [vmem:[#allocation1] ss:$4 sm:$0xff] %v875_v34  ;;  %v1801_v51 = vld [vmem:[#allocation7 + $0x1f8] sm:$0xff]  ;;  %v286_v54 = vpack.c.bf16 %v270_v41, %v270_v41  ;;  %v284_v55 = vpack.c.bf16 %v268_v42, %v268_v42  ;;  %v1817_v59 = vld [vmem:[#allocation7 + $0x1f0] sm:$0xff]  ;;  %v1819_v60 = vld [vmem:[#allocation7 + $0x128] sm:$0xff] }
  0x2b   :  { %721 = vmatpush.bf16.msra.mxu3 %v1757_v23  ;;  %2027 = vst [vmem:[#allocation20_spill] sm:$0xff] %v1793_v45  ;;  %v1823_v61 = vld [vmem:[#allocation7 + $0x168] sm:$0xff]  ;;  %v878_v18 = vld [vmem:[#allocation5 + $0x18] sm:$0xff]  ;;  %v1839_v40 = vld [vmem:[#allocation7 + $0x1a0] sm:$0xff] }
  0x2c   :  { %683 = vmatpush.bf16.msra.mxu0 %v1761_v24  ;;  %893 = vst [vmem:[#allocation1 + $0x1] ss:$4 sm:$0xff] %v877_v35  ;;  %v1825_v62 = vld [vmem:[#allocation7 + $0x1a8] sm:$0xff]  ;;  %v1833_v35 = vld [vmem:[#allocation7 + $0x120] sm:$0xff]  ;;  %v882_v39 = vld [vmem:[#allocation5 + $0x38] sm:$0xff] }
  0x2d   :  { %696 = vmatpush.bf16.msra.mxu1 %v1763_v25  ;;  %895 = vst [vmem:[#allocation1 + $0x2] ss:$4 sm:$0xff] %v879_v36  ;;  %v1827_v63 = vld [vmem:[#allocation7 + $0x1e8] sm:$0xff]  ;;  %v1835_v36 = vld [vmem:[#allocation7 + $0x160] sm:$0xff]  ;;  %v1845_v42 = vld [vmem:[#allocation7 + $0x118] sm:$0xff] }
  0x2e   :  { %709 = vmatpush.bf16.msra.mxu2 %v1767_v26  ;;  %2028 = vst [vmem:[#allocation21_spill] sm:$0xff] %v1801_v51  ;;  %v876_v17 = vld [vmem:[#allocation5 + $0x8] sm:$0xff]  ;;  %v271_v21 = vld.sshfl [vmem:[#allocation1 + $0x20] sm:$0xff pattern:$0x73625140]  ;;  %v1841_v41 = vld [vmem:[#allocation7 + $0x1e0] sm:$0xff] }
  0x2f   :  { %722 = vmatpush.bf16.msra.mxu3 %v1769_v27  ;;  %897 = vst [vmem:[#allocation1 + $0x3] ss:$4 sm:$0xff] %v881_v44  ;;  %v880_v20 = vld [vmem:[#allocation5 + $0x28] sm:$0xff]  ;;  %v272_v30 = vld.sshfl [vmem:[#allocation1 + $0x28] sm:$0xff pattern:$0x73625140] }
  0x30   :  { %684 = vmatpush.bf16.msra.mxu0 %v1771_v28  ;;  %2029 = vst [vmem:[#allocation22_spill] sm:$0xff] %v1817_v59  ;;  %v273_v33 = vld.sshfl [vmem:[#allocation1 + $0x30] sm:$0xff pattern:$0x73625140]  ;;  %v1847_v44 = vld [vmem:[#allocation7 + $0x158] sm:$0xff] }
  0x31   :  { %697 = vmatpush.bf16.msra.mxu1 %v1773_v29  ;;  %2030 = vst [vmem:[#allocation23_spill] sm:$0xff] %v1827_v63  ;;  %v274_v34 = vld.sshfl [vmem:[#allocation1 + $0x38] sm:$0xff pattern:$0x73625140]  ;;  %v1851_v47 = vld [vmem:[#allocation7 + $0x198] sm:$0xff] }
  0x32   :  { %710 = vmatpush.bf16.msra.mxu2 %v1777_v31  ;;  %899 = vst [vmem:[#allocation1 + $0x20] ss:$4 sm:$0xff] %v876_v17  ;;  %v1853_v49 = vld [vmem:[#allocation7 + $0x1d8] sm:$0xff]  ;;  %v1869_v17 = vld [vmem:[#allocation7 + $0x108] sm:$0xff]  ;;  %v290_v27 = vpack.c.bf16 %v274_v34, %v274_v34 }
  0x33   :  { %723 = vmatpush.bf16.msra.mxu3 %v1779_v32  ;;  %2031 = vst [vmem:[#allocation24_spill] sm:$0xff] %v1841_v41  ;;  %v289_v32 = vpack.c.bf16 %v273_v33, %v273_v33 }
  0x34   :  { %685 = vmatpush.bf16.msra.mxu0 %v1783_v37  ;;  %901 = vst [vmem:[#allocation1 + $0x21] ss:$4 sm:$0xff] %v878_v18  ;;  %v1871_v18 = vld [vmem:[#allocation7 + $0x148] sm:$0xff] }
  0x35   :  { %698 = vmatpush.bf16.msra.mxu1 %v1785_v38  ;;  %903 = vst [vmem:[#allocation1 + $0x22] ss:$4 sm:$0xff] %v880_v20  ;;  %v1875_v20 = vld [vmem:[#allocation7 + $0x188] sm:$0xff] }
  0x36   :  { %711 = vmatpush.bf16.msra.mxu2 %v1789_v43  ;;  %905 = vst [vmem:[#allocation1 + $0x23] ss:$4 sm:$0xff] %v882_v39  ;;  %v1877_v39 = vld [vmem:[#allocation7 + $0x1c8] sm:$0xff] }
  0x37   :  { %724 = vmatpush.bf16.msra.mxu3 %v1793_v45  ;;  %686 = vmatmul.bf16.vlgmr.msra.gmra.mxu0 %v283_v53  ;;  %2032 = vst [vmem:[#allocation25_spill] sm:$0xff] %v1853_v49  ;;  %v1859_v53 = vld [vmem:[#allocation7 + $0x150] sm:$0xff]  ;;  %v288_v45 = vpack.c.bf16 %v272_v30, %v272_v30 }
  0x38   :  { %730 = vmatpush.bf16.msrb.mxu0 %v1795_v46  ;;  %699 = vmatmul.bf16.vlgmr.msra.gmra.mxu1 %v284_v55  ;;  %v1865_v55 = vld [vmem:[#allocation7 + $0x1d0] sm:$0xff]  ;;  %2034 = vst [vmem:[#allocation27_spill] sm:$0xff] %v1877_v39 }
  0x39   :  { %743 = vmatpush.bf16.msrb.mxu1 %v1797_v48  ;;  %712 = vmatmul.bf16.vlgmr.msra.gmra.mxu2 %v285_v52  ;;  %v1857_v52 = vld [vmem:[#allocation7 + $0x110] sm:$0xff]  ;;  %2033 = vst [vmem:[#allocation26_spill] sm:$0xff] %v1865_v55 }
  0x3a   :  { %756 = vmatpush.bf16.msrb.mxu2 %v1799_v50  ;;  %725 = vmatmul.bf16.vlgmr.msra.gmra.mxu3 %v286_v54  ;;  %v1863_v54 = vld [vmem:[#allocation7 + $0x190] sm:$0xff] }
  0x3b   :  { %769 = vmatpush.bf16.msrb.mxu3 %v1801_v51  ;;  %v287_v51 = vpack.c.bf16 %v271_v21, %v271_v21  ;;  %v1904_v21 = vld [vmem:[#allocation8 + $0x28] sm:$0xff] }
  0x3c   :  { %731 = vmatpush.bf16.msrb.mxu0 %v1809_v56 }
  0x3d   :  { %744 = vmatpush.bf16.msrb.mxu1 %v1811_v57 }
  0x3e   :  { %757 = vmatpush.bf16.msrb.mxu2 %v1815_v58 }
  0x3f   :  { %770 = vmatpush.bf16.msrb.mxu3 %v1817_v59  ;;  %v1889_v59 = vld [vmem:[#allocation7 + $0x1c0] sm:$0xff] }
  0x40   :  { %732 = vmatpush.bf16.msrb.mxu0 %v1819_v60 }
  0x41   :  { %745 = vmatpush.bf16.msrb.mxu1 %v1823_v61 }
  0x42   :  { %758 = vmatpush.bf16.msrb.mxu2 %v1825_v62 }
  0x43   :  { %771 = vmatpush.bf16.msrb.mxu3 %v1827_v63  ;;  %v1887_v63 = vld [vmem:[#allocation7 + $0x180] sm:$0xff] }
  0x44   :  { %733 = vmatpush.bf16.msrb.mxu0 %v1833_v35 }
  0x45   :  { %746 = vmatpush.bf16.msrb.mxu1 %v1835_v36 }
  0x46   :  { %759 = vmatpush.bf16.msrb.mxu2 %v1839_v40 }
  0x47   :  { %772 = vmatpush.bf16.msrb.mxu3 %v1841_v41  ;;  %v1883_v41 = vld [vmem:[#allocation7 + $0x140] sm:$0xff] }
  0x48   :  { %734 = vmatpush.bf16.msrb.mxu0 %v1845_v42 }
  0x49   :  { %747 = vmatpush.bf16.msrb.mxu1 %v1847_v44 }
  0x4a   :  { %760 = vmatpush.bf16.msrb.mxu2 %v1851_v47 }
  0x4b   :  { %773 = vmatpush.bf16.msrb.mxu3 %v1853_v49  ;;  %v1881_v49 = vld [vmem:[#allocation7 + $0x100] sm:$0xff] }
  0x4c   :  { %735 = vmatpush.bf16.msrb.mxu0 %v1857_v52 }
  0x4d   :  { %748 = vmatpush.bf16.msrb.mxu1 %v1859_v53 }
  0x4e   :  { %761 = vmatpush.bf16.msrb.mxu2 %v1863_v54 }
  0x4f   :  { %774 = vmatpush.bf16.msrb.mxu3 %v1865_v55  ;;  %v1891_v55 = vld [vmem:[#allocation8 + $0x38] sm:$0xff] }
  0x50   :  { %736 = vmatpush.bf16.msrb.mxu0 %v1869_v17 }
  0x51   :  { %749 = vmatpush.bf16.msrb.mxu1 %v1871_v18 }
  0x52   :  { %762 = vmatpush.bf16.msrb.mxu2 %v1875_v20 }
  0x53   :  { %775 = vmatpush.bf16.msrb.mxu3 %v1877_v39  ;;  %v1898_v39 = vld [vmem:[#allocation8 + $0x30] sm:$0xff] }
  0x54   :  { %737 = vmatpush.bf16.msrb.mxu0 %v1881_v49 }
  0x55   :  { %750 = vmatpush.bf16.msrb.mxu1 %v1883_v41 }
  0x56   :  { %763 = vmatpush.bf16.msrb.mxu2 %v1887_v63 }
  0x57   :  { %776 = vmatpush.bf16.msrb.mxu3 %v1889_v59  ;;  %738 = vmatmul.bf16.vlgmr.msrb.gmra.mxu0 %v287_v51 }
  0x58   :  { %835 = vmatpush.bf16.msra.mxu0 %v1891_v55  ;;  %751 = vmatmul.bf16.vlgmr.msrb.gmra.mxu1 %v288_v45 }
  0x59   :  { %764 = vmatmul.bf16.vlgmr.msrb.gmra.mxu2 %v289_v32  ;;  %930 = vmatpush.bf16.msra.mxu1 %v1703_v0  ;;  %v1916_v0 = vld [vmem:[#allocation8 + $0x18] sm:$0xff] }
  0x5a   :  { %943 = vmatpush.bf16.msra.mxu2 %v1705_v1  ;;  %777 = vmatmul.bf16.vlgmr.msrb.gmra.mxu3 %v290_v27  ;;  %v1910_v1 = vld [vmem:[#allocation8 + $0x20] sm:$0xff] }
  0x5b   :  { %956 = vmatpush.bf16.msra.mxu3 %v1707_v2  ;;  %v1465_v2 = vld [vmem:[#allocation8 + $0x10] sm:$0xff] }
  0x5c   :  { %836 = vmatpush.bf16.msra.mxu0 %v1898_v39 }
  0x5d   :  { %931 = vmatpush.bf16.msra.mxu1 %v1713_v4  ;;  %v1464_v4 = vld [vmem:[#allocation8 + $0x8] sm:$0xff] }
  0x5e   :  { %944 = vmatpush.bf16.msra.mxu2 %v1715_v5  ;;  %v1463_v5 = vld [vmem:[#allocation8] sm:$0xff] }
  0x5f   :  { %957 = vmatpush.bf16.msra.mxu3 %v1719_v6 }
  0x60   :  { %837 = vmatpush.bf16.msra.mxu0 %v1904_v21 }
  0x61   :  { %932 = vmatpush.bf16.msra.mxu1 %v1725_v8 }
  0x62   :  { %945 = vmatpush.bf16.msra.mxu2 %v1727_v9  ;;  %v2035_v9 = vld [vmem:[#allocation18_spill] sm:$0xff] }
  0x63   :  { %958 = vmatpush.bf16.msra.mxu3 %v1731_v10 }
  0x64   :  { %838 = vmatpush.bf16.msra.mxu0 %v1910_v1 }
  0x65   :  { %933 = vmatpush.bf16.msra.mxu1 %v1737_v12  ;;  %v2036_v12 = vld [vmem:[#allocation19_spill] sm:$0xff] }
  0x66   :  { %946 = vmatpush.bf16.msra.mxu2 %v1739_v13 }
  0x67   :  { %959 = vmatpush.bf16.msra.mxu3 %v1743_v14 }
  0x68   :  { %839 = vmatpush.bf16.msra.mxu0 %v1916_v0 }
  0x69   :  { %934 = vmatpush.bf16.msra.mxu1 %v1747_v16  ;;  %v907_v16 = vld.sshfl [vmem:[#allocation1 + $0x8] sm:$0xff pattern:$0x73625140] }
  0x6a   :  { %947 = vmatpush.bf16.msra.mxu2 %v1751_v19 }
  0x6b   :  { %960 = vmatpush.bf16.msra.mxu3 %v1755_v22  ;;  %v908_v22 = vld.sshfl [vmem:[#allocation1 + $0x10] sm:$0xff pattern:$0x73625140] }
  0x6c   :  { %840 = vmatpush.bf16.msra.mxu0 %v1465_v2 }
  0x6d   :  { %935 = vmatpush.bf16.msra.mxu1 %v1761_v24 }
  0x6e   :  { %948 = vmatpush.bf16.msra.mxu2 %v1763_v25 }
  0x6f   :  { %961 = vmatpush.bf16.msra.mxu3 %v1767_v26 }
  0x70   :  { %841 = vmatpush.bf16.msra.mxu0 %v1464_v4 }
  0x71   :  { %936 = vmatpush.bf16.msra.mxu1 %v1771_v28 }
  0x72   :  { %949 = vmatpush.bf16.msra.mxu2 %v1773_v29  ;;  %v911_v29 = vld.sshfl [vmem:[#allocation1 + $0x28] sm:$0xff pattern:$0x73625140] }
  0x73   :  { %962 = vmatpush.bf16.msra.mxu3 %v1777_v31  ;;  %v927_v32 = vpack.c.bf16 %v911_v29, %v911_v29 }
  0x74   :  { %842 = vmatpush.bf16.msra.mxu0 %v1463_v5 }
  0x75   :  { %937 = vmatpush.bf16.msra.mxu1 %v1783_v37  ;;  %v912_v37 = vld.sshfl [vmem:[#allocation1 + $0x30] sm:$0xff pattern:$0x73625140] }
  0x76   :  { %950 = vmatpush.bf16.msra.mxu2 %v1785_v38  ;;  %v928_v38 = vpack.c.bf16 %v912_v37, %v912_v37 }
  0x77   :  { %963 = vmatpush.bf16.msra.mxu3 %v1789_v43  ;;  %v910_v43 = vld.sshfl [vmem:[#allocation1 + $0x20] sm:$0xff pattern:$0x73625140] }
  0x78   :  { %969 = vmatpush.bf16.msrb.mxu0 %v1709_v3  ;;  %v923_v3 = vpack.c.bf16 %v907_v16, %v907_v16 }
  0x79   :  { %982 = vmatpush.bf16.msrb.mxu1 %v1795_v46 }
  0x7a   :  { %995 = vmatpush.bf16.msrb.mxu2 %v1797_v48 }
  0x7b   :  { %1008 = vmatpush.bf16.msrb.mxu3 %v1799_v50  ;;  %951 = vmatmul.bf16.vlgmr.msra.gmra.mxu2 %v923_v3  ;;  %v926_v50 = vpack.c.bf16 %v910_v43, %v910_v43 }
  0x7c   :  { %970 = vmatpush.bf16.msrb.mxu0 %v1721_v7  ;;  %v2037_v7 = vld [vmem:[#allocation20_spill] sm:$0xff] }
  0x7d   :  { %983 = vmatpush.bf16.msrb.mxu1 %v1809_v56 }
  0x7e   :  { %996 = vmatpush.bf16.msrb.mxu2 %v1811_v57 }
  0x7f   :  { %1009 = vmatpush.bf16.msrb.mxu3 %v1815_v58 }
  0x80   :  { %971 = vmatpush.bf16.msrb.mxu0 %v1733_v11  ;;  %v924_v11 = vpack.c.bf16 %v908_v22, %v908_v22 }
  0x81   :  { %984 = vmatpush.bf16.msrb.mxu1 %v1819_v60 }
  0x82   :  { %997 = vmatpush.bf16.msrb.mxu2 %v1823_v61  ;;  %964 = vmatmul.bf16.vlgmr.msra.gmra.mxu3 %v924_v11 }
  0x83   :  { %1010 = vmatpush.bf16.msrb.mxu3 %v1825_v62 }
  0x84   :  { %972 = vmatpush.bf16.msrb.mxu0 %v1745_v15  ;;  %v906_v15 = vld.sshfl [vmem:[#allocation1] sm:$0xff pattern:$0x73625140] }
  0x85   :  { %985 = vmatpush.bf16.msrb.mxu1 %v1833_v35  ;;  %v922_v24 = vpack.c.bf16 %v906_v15, %v906_v15 }
  0x86   :  { %998 = vmatpush.bf16.msrb.mxu2 %v1835_v36  ;;  %v2038_v36 = vld [vmem:[#allocation21_spill] sm:$0xff] }
  0x87   :  { %1011 = vmatpush.bf16.msrb.mxu3 %v1839_v40  ;;  %938 = vmatmul.bf16.vlgmr.msra.gmra.mxu1 %v922_v24  ;;  %v2039_v40 = vld [vmem:[#allocation22_spill] sm:$0xff] }
  0x88   :  { %973 = vmatpush.bf16.msrb.mxu0 %v1757_v23  ;;  %v1969_v23 = vld [vmem:[%s2010_s3] ss:$0 sm:$0xff] }
  0x89   :  { %986 = vmatpush.bf16.msrb.mxu1 %v1845_v42  ;;  %v909_v42 = vld.sshfl [vmem:[#allocation1 + $0x18] sm:$0xff pattern:$0x73625140] }
  0x8a   :  { %999 = vmatpush.bf16.msrb.mxu2 %v1847_v44  ;;  %v925_v44 = vpack.c.bf16 %v909_v42, %v909_v42 }
  0x8b   :  { %1012 = vmatpush.bf16.msrb.mxu3 %v1851_v47  ;;  %v2041_v47 = vld [vmem:[#allocation24_spill] sm:$0xff] }
  0x8c   :  { %974 = vmatpush.bf16.msrb.mxu0 %v2035_v9 }
  0x8d   :  { %987 = vmatpush.bf16.msrb.mxu1 %v1857_v52  ;;  %v2043_v52 = vld [vmem:[#allocation26_spill] sm:$0xff] }
  0x8e   :  { %1000 = vmatpush.bf16.msrb.mxu2 %v1859_v53  ;;  %v2044_v53 = vld [vmem:[#allocation27_spill] sm:$0xff] }
  0x8f   :  { %1013 = vmatpush.bf16.msrb.mxu3 %v1863_v54  ;;  %v913_v54 = vld.sshfl [vmem:[#allocation1 + $0x38] sm:$0xff pattern:$0x73625140] }
  0x90   :  { %975 = vmatpush.bf16.msrb.mxu0 %v2036_v12 }
  0x91   :  { %988 = vmatpush.bf16.msrb.mxu1 %v1869_v17 }
  0x92   :  { %1001 = vmatpush.bf16.msrb.mxu2 %v1871_v18 }
  0x93   :  { %1014 = vmatpush.bf16.msrb.mxu3 %v1875_v20 }
  0x94   :  { %976 = vmatpush.bf16.msrb.mxu0 %v2037_v7 }
  0x95   :  { %989 = vmatpush.bf16.msrb.mxu1 %v1881_v49  ;;  %v2042_v49 = vld [vmem:[#allocation25_spill] sm:$0xff] }
  0x96   :  { %1002 = vmatpush.bf16.msrb.mxu2 %v1883_v41  ;;  %v2040_v41 = vld [vmem:[#allocation23_spill] sm:$0xff] }
  0x97   :  { %1015 = vmatpush.bf16.msrb.mxu3 %v1887_v63 }
  0x98   :  { %990 = vmatmul.bf16.vlgmr.msrb.gmra.mxu1 %v926_v50 }
  0x99   :  { %1036 = vmatpush.bf16.msra.mxu1 %v1891_v55  ;;  %1003 = vmatmul.bf16.vlgmr.msrb.gmra.mxu2 %v927_v32  ;;  %v929_v55 = vpack.c.bf16 %v913_v54, %v913_v54 }
  0x9a   :  { %1016 = vmatmul.bf16.vlgmr.msrb.gmra.mxu3 %v928_v38 }
  0x9d   :  { %1037 = vmatpush.bf16.msra.mxu1 %v1898_v39 }
  0xa1   :  { %1038 = vmatpush.bf16.msra.mxu1 %v1904_v21 }
  0xa5   :  { %1039 = vmatpush.bf16.msra.mxu1 %v1910_v1 }
  0xa9   :  { %1040 = vmatpush.bf16.msra.mxu1 %v1916_v0 }
  0xad   :  { %1041 = vmatpush.bf16.msra.mxu1 %v1465_v2 }
  0xb1   :  { %1042 = vmatpush.bf16.msra.mxu1 %v1464_v4 }
  0xb4   :  { %v687_v6 = vpop.f32.mrf.mxu0 }
  0xb5   :  { %v700_v8 = vpop.f32.mrf.mxu1  ;;  %v688_v27 = vadd.f32 %v1969_v23, %v687_v6  ;;  %1043 = vmatpush.bf16.msra.mxu1 %v1463_v5  ;;  %v1483_v6 = vld [vmem:[%s2012_s5] ss:$0 sm:$0xff] }
  0xb7   :  { %v701_v28 = vadd.f32 %v700_v8, %v688_v27 }
  0xbc   :  { %v713_v10 = vpop.f32.mrf.mxu2  ;;  %v689_v14 = vpop.f32.mrf.mxu0 }
  0xbd   :  { %v726_v13 = vpop.f32.mrf.mxu3  ;;  %v702_v19 = vpop.f32.mrf.mxu1  ;;  %v714_v31 = vadd.f32 %v713_v10, %v701_v28 }
  0xbf   :  { %v727_v45 = vadd.f32 %v726_v13, %v714_v31 }
  0xc4   :  { %v715_v25 = vpop.f32.mrf.mxu2 }
  0xc5   :  { %v728_v26 = vpop.f32.mrf.mxu3 }
  0xd4   :  { %v739_v46 = vpop.f32.mrf.mxu0 }
  0xd5   :  { %v752_v48 = vpop.f32.mrf.mxu1  ;;  %v740_v51 = vadd.f32 %v739_v46, %v727_v45 }
  0xd7   :  { %v753_v56 = vadd.f32 %v752_v48, %v740_v51 }
  0xdc   :  { %v765_v57 = vpop.f32.mrf.mxu2  ;;  %v741_v61 = vpop.f32.mrf.mxu0 }
  0xdd   :  { %v778_v58 = vpop.f32.mrf.mxu3  ;;  %v766_v60 = vadd.f32 %v765_v57, %v753_v56  ;;  %v754_v62 = vpop.f32.mrf.mxu1 }
  0xdf   :  { %v779_v63 = vadd.f32 %v778_v58, %v766_v60 }
  0xe1   :  { %v782_v30 = vmax.f32 %v779_v63, 0.0 }
  0xe3   :  { %v783_v33 = vpack.c.bf16 %v782_v30, %v782_v30 }
  0xe4   :  { %v767_v34 = vpop.f32.mrf.mxu2 }
  0xe5   :  { %v780_v35 = vpop.f32.mrf.mxu3  ;;  %843 = vmatmul.bf16.vlgmr.msra.gmra.mxu0 %v783_v33 }
  0xe6   :  { %1021 = vmatpush.bf16.msra.mxu0 %v2038_v36 }
  0xea   :  { %1022 = vmatpush.bf16.msra.mxu0 %v2039_v40 }
  0xee   :  { %1023 = vmatpush.bf16.msra.mxu0 %v2040_v41 }
  0xf2   :  { %1024 = vmatpush.bf16.msra.mxu0 %v2041_v47 }
  0xf5   :  { %977 = vmatmul.bf16.vlgmr.msrb.gmra.mxu0 %v925_v44 }
  0xf6   :  { %1025 = vmatpush.bf16.msra.mxu0 %v2042_v49 }
  0xfa   :  { %1026 = vmatpush.bf16.msra.mxu0 %v2043_v52 }
  0xfe   :  { %1027 = vmatpush.bf16.msra.mxu0 %v2044_v53  ;;  %v952_v18 = vpop.f32.mrf.mxu2 }
 0x102   :  { %1028 = vmatpush.bf16.msra.mxu0 %v1889_v59 }
 0x104   :  { %v939_v17 = vpop.f32.mrf.mxu1 }
 0x105   :  { %1029 = vmatmul.bf16.vlgmr.msra.gmra.mxu0 %v929_v55  ;;  %v965_v20 = vpop.f32.mrf.mxu3  ;;  %v940_v14 = vadd.f32 %v1969_v23, %v939_v17 }
 0x106   :  { %v954_v21 = vpop.f32.mrf.mxu2 }
 0x107   :  { %v953_v25 = vadd.f32 %v952_v18, %v940_v14 }
 0x109   :  { %v966_v26 = vadd.f32 %v965_v20, %v953_v25 }
 0x10c   :  { %v941_v39 = vpop.f32.mrf.mxu1 }
 0x10d   :  { %v967_v1 = vpop.f32.mrf.mxu3 }
 0x115   :  { %v991_v0 = vpop.f32.mrf.mxu1 }
 0x11c   :  { %v1004_v2 = vpop.f32.mrf.mxu2 }
 0x11d   :  { %v1017_v4 = vpop.f32.mrf.mxu3  ;;  %v993_v5 = vpop.f32.mrf.mxu1 }
 0x124   :  { %v1006_v8 = vpop.f32.mrf.mxu2 }
 0x125   :  { %v1019_v10 = vpop.f32.mrf.mxu3 }
 0x162   :  { %v844_v9 = vpop.f32.mrf.mxu0 }
 0x163   :  { %v845_v12 = vadd.f32 %v1483_v6, %v844_v9 }
 0x165   :  { %v848_v59 = vpack.c.bf16 %v845_v12, %v845_v12 }
 0x167   :  { %v850_v13 = vrot.slane %v848_v59, 3 }
 0x169   :  { %v854_v16 = vsel %vm851_vm0, %v848_v59, %v850_v13  ;;  %v856_v19 = vsel %vm855_vm1, %v848_v59, %v850_v13  ;;  %v860_v3 = vsel %vm859_vm2, %v848_v59, %v850_v13  ;;  %v864_v22 = vsel %vm863_vm3, %v848_v59, %v850_v13 }
 0x16a   :  { %v858_v7 = vrot.slane %v856_v19, 1  ;;  %v862_v11 = vrot.slane %v860_v3, 2  ;;  %v866_v15 = vrot.slane %v864_v22, 3  ;;  %871 = vst [vmem:[#allocation10] sm:$0x1] %v854_v16  ;;  %v846_v24 = vpop.f32.mrf.mxu0 }
 0x16c   :  { %872 = vst [vmem:[#allocation10 + $0x1] sm:$0x1] %v858_v7 }
 0x16d   :  { %873 = vst [vmem:[#allocation10 + $0x2] sm:$0x1] %v862_v11 }
 0x16e   :  { %874 = vst [vmem:[#allocation10 + $0x3] sm:$0x1] %v866_v15 }
 0x172   :  { %v978_v27 = vpop.f32.mrf.mxu0 }
 0x173   :  { %v979_v23 = vadd.f32 %v978_v27, %v966_v26 }
 0x175   :  { %v992_v28 = vadd.f32 %v991_v0, %v979_v23 }
 0x177   :  { %v1005_v31 = vadd.f32 %v1004_v2, %v992_v28 }
 0x179   :  { %v1018_v32 = vadd.f32 %v1017_v4, %v1005_v31 }
 0x17a   :  { %v980_v29 = vpop.f32.mrf.mxu0 }
 0x182   :  { %v1030_v37 = vpop.f32.mrf.mxu0 }
 0x183   :  { %v1031_v38 = vadd.f32 %v1030_v37, %v1018_v32 }
 0x185   :  { %v1034_v43 = vmax.f32 %v1031_v38, 0.0 }
 0x187   :  { %v1035_v45 = vpack.c.bf16 %v1034_v43, %v1034_v43 }
 0x189   :  { %1044 = vmatmul.bf16.vlgmr.msra.gmra.mxu1 %v1035_v45 }
 0x18a   :  { %v1032_v46 = vpop.f32.mrf.mxu0 }
 0x206   :  { %v1045_v48 = vpop.f32.mrf.mxu1 }
 0x207   :  { %v1046_v50 = vadd.f32 %v1483_v6, %v1045_v48 }
 0x209   :  { %v1049_v51 = vpack.c.bf16 %v1046_v50, %v1046_v50 }
 0x20b   :  { %v1051_v56 = vrot.slane %v1049_v51, 3 }
 0x20d   :  { %v1054_v57 = vsel %vm851_vm0, %v1049_v51, %v1051_v56  ;;  %v1055_v58 = vsel %vm855_vm1, %v1049_v51, %v1051_v56  ;;  %v1058_v60 = vsel %vm859_vm2, %v1049_v51, %v1051_v56  ;;  %v1061_v61 = vsel %vm863_vm3, %v1049_v51, %v1051_v56 }
 0x20e   :  { %v1057_v62 = vrot.slane %v1055_v58, 1  ;;  %v1060_v63 = vrot.slane %v1058_v60, 2  ;;  %v1063_v30 = vrot.slane %v1061_v61, 3  ;;  %1068 = vst [vmem:[#allocation11] sm:$0x1] %v1054_v57  ;;  %v1047_v33 = vpop.f32.mrf.mxu1 }
 0x210   :  { %1069 = vst [vmem:[#allocation11 + $0x1] sm:$0x1] %v1057_v62 }
 0x211   :  { %1070 = vst [vmem:[#allocation11 + $0x2] sm:$0x1] %v1060_v63 }
 0x212   :  { %1071 = vst [vmem:[#allocation11 + $0x3] sm:$0x1] %v1063_v30 }
 0x213   :  { %1075 = vsyncadd [#allocation4], 48  ;;  %s1078_s25 = sshll.u32 %s2013_s6, 4  ;;  %s1646_s26 = smov [#allocation10]   ;;  %s1079_s25 = int_to_ptr.hbm [resolvable:$true] %s1078_s25 }
 0x214   :  { %s1076_s27 = sshll.u32 %s1646_s26, 4  ;;  %s1647_s28 = smov 1   ;;  %s1077_s27 = int_to_ptr.vmem [resolvable:$true] %s1076_s27 }
 0x215   :  { %1084 = dma.vmem_to_hbm [thread:$0]  %s1077_s27, 16, %s1079_s25, [#allocation4], %s1640_s30, %s1640_s30, %s1647_s28  }
 0x216   :  { %1088 = vsyncadd [#allocation12], 48  ;;  %s1091_s9 = sshll.u32 %s2014_s7, 4  ;;  %s1648_s10 = smov [#allocation11]   ;;  %s1092_s9 = int_to_ptr.hbm [resolvable:$true] %s1091_s9 }
 0x217   :  { %s1089_s11 = sshll.u32 %s1648_s10, 4  ;;  %s1090_s11 = int_to_ptr.vmem [resolvable:$true] %s1089_s11 }
 0x218   :  { %1097 = dma.vmem_to_hbm [thread:$0]  %s1090_s11, 16, %s1092_s9, [#allocation12], %s1640_s30, %s1640_s30, %s1647_s28  }
 0x219   :  { %1634 = dma.done.wait [#allocation4], 64  }
 0x21a   :  { %1635 = vsyncadd [#allocation4], 4294967232 }
 0x21b   :  { %1636 = dma.done.wait [#allocation12], 64  }
 0x21c   :  { %1637 = vsyncadd [#allocation12], 4294967232 }
 0x21d   :  { %1106 = vsyncpa [#allocation3], 1 }
 0x21e   :  { %1107 = vsyncpa [#allocation6], 1 }
 0x21f   :  { %1108 = vsyncpa [#allocation9], 1 }
 0x220   :  { %1109 = vsyncpa [#allocation4], 1 }
 0x221   :  { %1110 = vsyncpa [#allocation12], 1 }

</bundles_post_ra>
